<compile_context>
chip_gen: v7x
topology: tpu7x:2x2x1
jax: 0.10.0
libtpu: 0.0.40
codegen_flags: <defaults>
</compile_context>

<pallas_src>
import math
import numpy as np
import jax
import jax.numpy as jnp
from jax.experimental import pallas as pl
from jax.experimental.pallas import tpu as pltpu

# ----------------------------- configuration (MambaVision Mlp) ----------------
IN_FEATURES = 32
MLP_RATIO = 4.0
HIDDEN_FEATURES = int(IN_FEATURES * MLP_RATIO)   # 128 -> lane-dense hidden dim
OUT_FEATURES = IN_FEATURES                       # out_features defaults to in_features

_SQRT2 = math.sqrt(2.0)


def _gelu(x):
    # Exact (erf) GELU, matching nn.GELU() default.
    return 0.5 * x * (1.0 + jax.lax.erf(x / _SQRT2))


# ----------------------------- fused Mlp kernel --------------------------------
def _mlp_kernel(x_ref, w1_ref, b1_ref, w2_ref, b2_ref, o_ref):
    # fc1 (MXU) + bias + exact GELU (EUP/VPU), hidden stays in VMEM (lane-dense 128)
    h = jnp.dot(x_ref[...], w1_ref[...], preferred_element_type=jnp.float32) + b1_ref[...]
    h = _gelu(h)
    # drop1 / norm (Identity) / drop2 are no-ops in eval (p=0.0, norm_layer=None)
    y = jnp.dot(h, w2_ref[...], preferred_element_type=jnp.float32) + b2_ref[...]
    o_ref[...] = y.astype(o_ref.dtype)


def mlp_forward(x, fc1_w, fc1_b, fc2_w, fc2_b, *, block_m=256):
    """Fused Mlp forward.  x: (..., in_features) -> (..., out_features)."""
    orig_shape = x.shape
    d_in = orig_shape[-1]
    d_hidden = fc1_w.shape[1]
    d_out = fc2_w.shape[1]
    m = int(np.prod(orig_shape[:-1]))
    x2 = x.reshape(m, d_in)

    # Row tiling: one full-array block when small, else 256-row tiles (pad rows up).
    if m <= block_m:
        bm, m_pad = m, m
    else:
        bm = block_m
        m_pad = pl.cdiv(m, bm) * bm
    if m_pad != m:
        x2 = jnp.pad(x2, ((0, m_pad - m), (0, 0)))

    b1r = fc1_b.reshape(1, d_hidden)
    b2r = fc2_b.reshape(1, d_out)

    out = pl.pallas_call(
        _mlp_kernel,
        out_shape=jax.ShapeDtypeStruct((m_pad, d_out), x.dtype),
        grid=(m_pad // bm,),
        in_specs=[
            pl.BlockSpec((bm, d_in), lambda i: (i, 0)),
            pl.BlockSpec((d_in, d_hidden), lambda i: (0, 0)),
            pl.BlockSpec((1, d_hidden), lambda i: (0, 0)),
            pl.BlockSpec((d_hidden, d_out), lambda i: (0, 0)),
            pl.BlockSpec((1, d_out), lambda i: (0, 0)),
        ],
        out_specs=pl.BlockSpec((bm, d_out), lambda i: (i, 0)),
        compiler_params=pltpu.CompilerParams(
            dimension_semantics=("parallel",)),
    )(x2, fc1_w, b1r, fc2_w, b2r)

    if m_pad != m:
        out = out[:m]
    return out.reshape(*orig_shape[:-1], d_out)


# ----------------------------- pure-JAX reference ------------------------------
def mlp_reference(x, fc1_w, fc1_b, fc2_w, fc2_b):
    h = jnp.dot(x, fc1_w, preferred_element_type=jnp.float32) + fc1_b
    h = jax.nn.gelu(h, approximate=False)
    return jnp.dot(h, fc2_w, preferred_element_type=jnp.float32) + fc2_b


# ----------------------------- deterministic init ------------------------------
def init_params(key):
    k1, k2, k3, k4 = jax.random.split(key, 4)
    fc1_w = jax.random.normal(k1, (IN_FEATURES, HIDDEN_FEATURES), jnp.float32) * 0.02
    fc1_b = jax.random.normal(k2, (HIDDEN_FEATURES,), jnp.float32) * 0.02
    fc2_w = jax.random.normal(k3, (HIDDEN_FEATURES, OUT_FEATURES), jnp.float32) * 0.02
    fc2_b = jax.random.normal(k4, (OUT_FEATURES,), jnp.float32) * 0.02
    return fc1_w, fc1_b, fc2_w, fc2_b


# ----------------------------- main --------------------------------------------
if __name__ == "__main__":
    key = jax.random.PRNGKey(0)
    kx, kp = jax.random.split(key)

    # batch=2, seq=8 tokens, in_features=32 (consistent with MambaVision dim=32,
    # mlp_ratio=4.0 -> hidden=128, out=32).
    x = jax.random.normal(kx, (2, 8, IN_FEATURES), jnp.float32)
    fc1_w, fc1_b, fc2_w, fc2_b = init_params(kp)

    fwd = jax.jit(mlp_forward)
    out = jax.block_until_ready(fwd(x, fc1_w, fc1_b, fc2_w, fc2_b))

    ref = jax.block_until_ready(mlp_reference(x, fc1_w, fc1_b, fc2_w, fc2_b))
    assert out.shape == (2, 8, OUT_FEATURES), out.shape
    if not np.allclose(np.asarray(out), np.asarray(ref), rtol=1e-3, atol=1e-3):
        raise RuntimeError("Pallas Mlp output does not match reference")

    print("KERNEL_OK")
</pallas_src>

<mosaic_0001>
module attributes {stable_mosaic.version = 11 : i64} {
  func.func @_mlp_kernel(%arg0: i32, %arg1: memref<16x32xf32, #tpu.memory_space<vmem>>, %arg2: memref<32x128xf32, #tpu.memory_space<vmem>>, %arg3: memref<1x128xf32, #tpu.memory_space<vmem>>, %arg4: memref<128x32xf32, #tpu.memory_space<vmem>>, %arg5: memref<1x32xf32, #tpu.memory_space<vmem>>, %arg6: memref<16x32xf32, #tpu.memory_space<vmem>>) attributes {dimension_semantics = [#tpu.dimension_semantics<parallel>], iteration_bounds = array<i64: 1>, scalar_prefetch = 0 : i64, scratch_operands = 0 : i64, tpu.core_type = #tpu.core_type<tc>, window_params = [{transform_indices = @transform_0, window_bounds = array<i64: 16, 32>}, {pipeline_mode = #tpu.pipeline_mode<synchronous>, transform_indices = @transform_1, window_bounds = array<i64: 32, 128>}, {pipeline_mode = #tpu.pipeline_mode<synchronous>, transform_indices = @transform_2, window_bounds = array<i64: 1, 128>}, {pipeline_mode = #tpu.pipeline_mode<synchronous>, transform_indices = @transform_3, window_bounds = array<i64: 128, 32>}, {pipeline_mode = #tpu.pipeline_mode<synchronous>, transform_indices = @transform_4, window_bounds = array<i64: 1, 32>}, {transform_indices = @transform_5, window_bounds = array<i64: 16, 32>}]} {
    %c0 = arith.constant 0 : index
    %c0_0 = arith.constant 0 : index
    %0 = vector.load %arg1[%c0, %c0_0] : memref<16x32xf32, #tpu.memory_space<vmem>>, vector<16x32xf32>
    %c0_1 = arith.constant 0 : index
    %c0_2 = arith.constant 0 : index
    %1 = vector.load %arg2[%c0_1, %c0_2] : memref<32x128xf32, #tpu.memory_space<vmem>>, vector<32x128xf32>
    %cst = arith.constant dense<0.000000e+00> : vector<16x128xf32>
    %2 = tpu.matmul %0, %1, %cst {dimension_numbers = #tpu.dot_dimension_numbers<[1], [0], [0], [1], [0, 0, 1, 1], [], []>} : vector<16x32xf32>, vector<32x128xf32>, vector<16x128xf32> -> vector<16x128xf32>
    %c0_3 = arith.constant 0 : index
    %c0_4 = arith.constant 0 : index
    %3 = vector.load %arg3[%c0_3, %c0_4] : memref<1x128xf32, #tpu.memory_space<vmem>>, vector<1x128xf32>
    %4 = vector.broadcast %3 : vector<1x128xf32> to vector<16x128xf32>
    %5 = arith.addf %2, %4 : vector<16x128xf32>
    %cst_5 = arith.constant 5.000000e-01 : f32
    %6 = vector.broadcast %cst_5 : f32 to vector<16x128xf32>
    %7 = arith.mulf %6, %5 : vector<16x128xf32>
    %cst_6 = arith.constant 1.41421354 : f32
    %8 = vector.broadcast %cst_6 : f32 to vector<16x128xf32>
    %9 = arith.divf %5, %8 : vector<16x128xf32>
    %10 = math.erf %9 : vector<16x128xf32>
    %cst_7 = arith.constant 1.000000e+00 : f32
    %11 = vector.broadcast %cst_7 : f32 to vector<16x128xf32>
    %12 = arith.addf %11, %10 : vector<16x128xf32>
    %13 = arith.mulf %7, %12 : vector<16x128xf32>
    %c0_8 = arith.constant 0 : index
    %c0_9 = arith.constant 0 : index
    %14 = vector.load %arg4[%c0_8, %c0_9] : memref<128x32xf32, #tpu.memory_space<vmem>>, vector<128x32xf32>
    %cst_10 = arith.constant dense<0.000000e+00> : vector<16x32xf32>
    %15 = tpu.matmul %13, %14, %cst_10 {dimension_numbers = #tpu.dot_dimension_numbers<[1], [0], [0], [1], [0, 0, 1, 1], [], []>} : vector<16x128xf32>, vector<128x32xf32>, vector<16x32xf32> -> vector<16x32xf32>
    %c0_11 = arith.constant 0 : index
    %c0_12 = arith.constant 0 : index
    %16 = vector.load %arg5[%c0_11, %c0_12] : memref<1x32xf32, #tpu.memory_space<vmem>>, vector<1x32xf32>
    %17 = vector.broadcast %16 : vector<1x32xf32> to vector<16x32xf32>
    %18 = arith.addf %15, %17 : vector<16x32xf32>
    %c0_13 = arith.constant 0 : index
    %c0_14 = arith.constant 0 : index
    %19 = vector.load %arg6[%c0_13, %c0_14] : memref<16x32xf32, #tpu.memory_space<vmem>>, vector<16x32xf32>
    tpu.vector_store %arg6[%c0_13, %c0_14], %18 {strides = array<i32>} : memref<16x32xf32, #tpu.memory_space<vmem>>, vector<16x32xf32>,
    return
  }
  func.func @transform_0(%arg0: i32) -> (i32, i32) {
    %c0_i32 = arith.constant 0 : i32
    %c0_i32_0 = arith.constant 0 : i32
    return %arg0, %c0_i32 : i32, i32
  }
  func.func @transform_1(%arg0: i32) -> (i32, i32) {
    %c0_i32 = arith.constant 0 : i32
    %c0_i32_0 = arith.constant 0 : i32
    %c0_i32_1 = arith.constant 0 : i32
    return %c0_i32, %c0_i32_0 : i32, i32
  }
  func.func @transform_2(%arg0: i32) -> (i32, i32) {
    %c0_i32 = arith.constant 0 : i32
    %c0_i32_0 = arith.constant 0 : i32
    %c0_i32_1 = arith.constant 0 : i32
    return %c0_i32, %c0_i32_0 : i32, i32
  }
  func.func @transform_3(%arg0: i32) -> (i32, i32) {
    %c0_i32 = arith.constant 0 : i32
    %c0_i32_0 = arith.constant 0 : i32
    %c0_i32_1 = arith.constant 0 : i32
    return %c0_i32, %c0_i32_0 : i32, i32
  }
  func.func @transform_4(%arg0: i32) -> (i32, i32) {
    %c0_i32 = arith.constant 0 : i32
    %c0_i32_0 = arith.constant 0 : i32
    %c0_i32_1 = arith.constant 0 : i32
    return %c0_i32, %c0_i32_0 : i32, i32
  }
  func.func @transform_5(%arg0: i32) -> (i32, i32) {
    %c0_i32 = arith.constant 0 : i32
    %c0_i32_0 = arith.constant 0 : i32
    return %arg0, %c0_i32 : i32, i32
  }
}

</mosaic_0001>

<bundles_post_ra>
// kernel: mlp_forward.1
= control target key start
LH: loop header
LB: loop body
LE: loop exit
PB: predicated region body
PF: predicated region fallthrough
CT: control target
= control target key end

     0   :  { %vm34_vm0 = vcmask 261120   ;;  %s509_s0 = inlined_call_operand.vmem [shape: f32[16,32], index: 0, kind: input, shape index: {}]   ;;  %s510_s1 = inlined_call_operand.vmem [shape: f32[32,128], index: 1, kind: input, shape index: {}]   ;;  %s511_s2 = inlined_call_operand.vmem [shape: f32[1,128], index: 2, kind: input, shape index: {}]   ;;  %s512_s3 = inlined_call_operand.vmem [shape: f32[128,32], index: 3, kind: input, shape index: {}]   ;;  %s513_s4 = inlined_call_operand.vmem [shape: f32[1,32], index: 4, kind: input, shape index: {}]   ;;  %s514_s5 = inlined_call_operand.hbm [shape: f32[16,32], index: 5, kind: output, shape index: {}]  }
   0x1   :  { %v23_v0 = vld [vmem:[%s510_s1] sm:$0xff]  ;;  %v24_v1 = vld [vmem:[%s510_s1 + $0x8] sm:$0xff]  ;;  %v25_v2 = vld [vmem:[%s510_s1 + $0x10] sm:$0xff] }
   0x2   :  { %v317_v3 = vpack.c.bf16 %v24_v1, %v23_v0  ;;  %v26_v4 = vld [vmem:[%s510_s1 + $0x18] sm:$0xff]  ;;  %v21_v5 = vld [vmem:[%s509_s0] sm:$0xff]  ;;  %v128_v8 = vld [vmem:[%s512_s3 + $0x8] sm:$0xff] }
   0x3   :  { %v321_v6 = vpack.c.bf16 %v26_v4, %v25_v2  ;;  %279 = vmatprep.mubr.msk.f32.mxu0 %vm34_vm0, %v21_v5  ;;  %v127_v7 = vld [vmem:[%s512_s3] sm:$0xff]  ;;  %v129_v9 = vld [vmem:[%s512_s3 + $0x10] sm:$0xff]  ;;  %v130_v11 = vld [vmem:[%s512_s3 + $0x18] sm:$0xff] }
   0x4   :  { %318 = vmatprep.subr.bf16.mxu0 %v317_v3  ;;  %v325_v10 = vpack.c.bf16 %v128_v8, %v127_v7  ;;  %v329_v12 = vpack.c.bf16 %v130_v11, %v129_v9  ;;  %v131_v13 = vld [vmem:[%s512_s3 + $0x20] sm:$0xff]  ;;  %v132_v14 = vld [vmem:[%s512_s3 + $0x28] sm:$0xff] }
   0x5   :  { %320 = vmatpush3.bf16.msra.mxu0 %v317_v3 }
   0x6   :  { %10 = vsyncpa [#allocation3], 0  ;;  %322 = vmatprep.subr.bf16.mxu0 %v321_v6  ;;  %326 = vmatprep.subr.bf16.mxu1 %v325_v10  ;;  %v333_v15 = vpack.c.bf16 %v132_v14, %v131_v13  ;;  %v22_v16 = vld [vmem:[%s509_s0 + $0x8] sm:$0xff]  ;;  %v133_v17 = vld [vmem:[%s512_s3 + $0x30] sm:$0xff]  ;;  %s388_s11 = smov [#allocation2]  }
   0x7   :  { %328 = vmatpush3.bf16.msra.mxu1 %v325_v10  ;;  %v134_v18 = vld [vmem:[%s512_s3 + $0x38] sm:$0xff]  ;;  %v135_v20 = vld [vmem:[%s512_s3 + $0x40] sm:$0xff]  ;;  %v136_v21 = vld [vmem:[%s512_s3 + $0x48] sm:$0xff]  ;;  %s232_s12 = sshll.u32 %s388_s11, 4  ;;  %s233_s12 = int_to_ptr.vmem [resolvable:$true] %s232_s12 }
   0x8   :  { %330 = vmatprep.subr.bf16.mxu1 %v329_v12  ;;  %v337_v19 = vpack.c.bf16 %v134_v18, %v133_v17  ;;  %v341_v22 = vpack.c.bf16 %v136_v21, %v135_v20  ;;  %v137_v23 = vld [vmem:[%s512_s3 + $0x50] sm:$0xff]  ;;  %v138_v24 = vld [vmem:[%s512_s3 + $0x58] sm:$0xff]  ;;  %v139_v26 = vld [vmem:[%s512_s3 + $0x60] sm:$0xff]  ;;  %s364_s13 = scalar_lea.vmem %s233_s12, 256  ;;  %p369_p1 = scmp.lt.s32.totalorder %s233_s12, %s233_s12 }
   0x9   :  { %324 = vmatpush3.bf16.msra.mxu0 %v321_v6  ;;  %v345_v25 = vpack.c.bf16 %v138_v24, %v137_v23  ;;  %v140_v27 = vld [vmem:[%s512_s3 + $0x68] sm:$0xff]  ;;  %v141_v29 = vld [vmem:[%s512_s3 + $0x70] sm:$0xff]  ;;  %v142_v30 = vld [vmem:[%s512_s3 + $0x78] sm:$0xff]  ;;  %p365_p0 = scmp.ne.s32.totalorder %s233_s12, %s364_s13  ;;  %p370_p2 = scmp.lt.s32.totalorder %s364_s13, %s364_s13 }
   0xa   :  { %v349_v28 = vpack.c.bf16 %v140_v27, %v139_v26  ;;  %v353_v31 = vpack.c.bf16 %v142_v30, %v141_v29  ;;  %v243_v32 = vld [vmem:[%s511_s2] ss:$0 sm:$0xff] }
   0xb   :  { %332 = vmatpush3.bf16.msra.mxu1 %v329_v12  ;;  %v246_v47 = vld [vmem:[%s513_s4] ss:$0 sm:$0xff]  ;;  %p371_p3 = por %p370_p2, %p369_p1 }
   0xc   :  { %280 = vmatmul.mubr.msk.f32.vlgmr.msra.gmra.mrb[0].mxu0 %vm34_vm0, %v22_v16  ;;  %334 = vmatprep.subr.bf16.mxu1 %v333_v15 }
   0xd   :  { %p372_p4 = pnand %p371_p3, %p365_p0 }
   0xf   :  { %336 = vmatpush3.bf16.msra.mxu1 %v333_v15 }
  0x10   :  { %338 = vmatprep.subr.bf16.mxu1 %v337_v19 }
  0x13   :  { %340 = vmatpush3.bf16.msra.mxu1 %v337_v19 }
  0x14   :  { %342 = vmatprep.subr.bf16.mxu1 %v341_v22 }
  0x17   :  { %344 = vmatpush3.bf16.msra.mxu1 %v341_v22 }
  0x18   :  { %346 = vmatprep.subr.bf16.mxu1 %v345_v25 }
  0x1b   :  { %348 = vmatpush3.bf16.msra.mxu1 %v345_v25 }
  0x1c   :  { %350 = vmatprep.subr.bf16.mxu1 %v349_v28 }
  0x1f   :  { %352 = vmatpush3.bf16.msra.mxu1 %v349_v28 }
  0x20   :  { %354 = vmatprep.subr.bf16.mxu1 %v353_v31 }
  0x23   :  { %356 = vmatpush3.bf16.msra.mxu1 %v353_v31 }
  0xdf   :  { %v281_v33 = vpop.f32.mrb[0].mxu0 }
  0xe0   :  { %v113_v34 = vadd.f32 %v281_v33, %v243_v32  ;;  %v107_v35 = vpop.f32.mrb[1].mxu0 }
  0xe1   :  { %v108_v36 = vadd.f32 %v243_v32, %v107_v35 }
  0xe2   :  { %v120_v37 = vmul.f32 0.70710677, %v113_v34  ;;  %v117_v44 = vmul.f32 0.5, %v113_v34 }
  0xe3   :  { %v119_v38 = vmul.f32 0.70710677, %v108_v36  ;;  %v116_v42 = vmul.f32 0.5, %v108_v36 }
  0xe4   :  { %360 = verf.f32 %v120_v37 }
  0xe5   :  { %362 = verf.f32 %v119_v38 }
  0xee   :  { %v361_v39 = vpop.eup %360 }
  0xef   :  { %v363_v40 = vpop.eup %362  ;;  %v124_v41 = vadd.f32 1.0, %v361_v39 }
  0xf0   :  { %v123_v43 = vadd.f32 1.0, %v363_v40 }
  0xf1   :  { %v126_v46 = vmul.f32 %v124_v41, %v117_v44 }
  0xf2   :  { %v125_v45 = vmul.f32 %v123_v43, %v116_v42 }
  0xf4   :  { %314 = vmatprep.mubr.f32.mxu1 %v125_v45 }
  0xf5   :  { %315 = vmatmul.mubr.f32.vlgmr.msra.gmra.mrb[0].mxu1 %v126_v46 }
 0x1c8   :  { %v316_v48 = vpop.f32.mrb[0].mxu1 }
 0x1c9   :  { %v222_v49 = vadd.f32 %v316_v48, %v246_v47  ;;  %v216_v50 = vpop.f32.mrb[1].mxu1 }
 0x1ca   :  { %v217_v51 = vadd.f32 %v246_v47, %v216_v50 }
 0x1cb   :  { %226 = vst.msk [vmem:[#allocation2 + $0x8] sm:$0xff] %vm34_vm0, %v222_v49 }
 0x1cc   :  { %225 = vst.msk [vmem:[#allocation2] sm:$0xff] %vm34_vm0, %v217_v51 }
 0x1cd   :  { %375 = shalt.err (!%p372_p4)
}
 0x1ce   :  { %s376_s15 = scalar_lea.hbm %s514_s5, 256 }
 0x1cf   :  { %p377_p5 = scmp.ne.s32.totalorder %s514_s5, %s376_s15  ;;  %p380_p6 = scmp.lt.u32.totalorder %s376_s15, %s514_s5 }
 0x1d1   :  { %p382_p7 = pnand %p380_p6, %p377_p5 }
 0x1d3   :  { %385 = shalt.err (!%p382_p7)
}
 0x1d4   :  { %s389_s20 = smov 128   ;;  %s390_s21 = smov 8  }
 0x1d5   :  { %238 = dma.vmem_to_hbm [thread:$0]  %s233_s12, 256, %s514_s5, [#allocation3], %s389_s20, %s389_s20, %s390_s21  }
 0x1d6   :  { %386 = dma.done.wait [#allocation3], 256  }
 0x1d7   :  { %387 = vsyncadd [#allocation3], 4294967040 }
 0x1d8   :  { %242 = vsyncpa [#allocation3], 1 }

</bundles_post_ra>
